<compile_context>
chip_gen: v6e
topology: v6e:2x2x1
jax: 0.10.0
libtpu: 0.0.40
codegen_flags: <defaults>
</compile_context>

<pallas_src>
import numpy as np
import jax
import jax.numpy as jnp
from jax.experimental import pallas as pl
from jax.experimental.pallas import tpu as pltpu

_MIB = 1024 * 1024


def _pair_indices(num_field: int):
    p1 = np.repeat(np.arange(num_field - 1), np.arange(num_field - 1, 0, -1))
    p2 = np.concatenate([np.arange(i, num_field) for i in range(1, num_field)], axis=0)
    return p1.astype(np.int32), p2.astype(np.int32)


def _roundup(x: int, m: int) -> int:
    return ((x + m - 1) // m) * m


def _vmem_capacity_bytes() -> int:
    """Physical VMEM of the current chip; conservative fallback if unknown."""
    try:
        return int(pltpu.get_tpu_info().vmem_capacity_bytes)
    except Exception:
        return 64 * _MIB  # v7x per-TensorCore figure (the smallest generation)


def _make_kernel(F: int, D: int):
    """Flat-lane kernel: batch on sublanes, all (pair, part) features on lanes."""

    def kernel(x_ref, o_ref):
        # x_ref block: (TB, F*D); o_ref block: (TB, P*3*D)
        off = 0
        for i in range(F - 1):                      # static unroll: F-1 segments
            L = F - 1 - i                           # pairs (i, i+1) .. (i, F-1)
            xi = x_ref[:, i * D:(i + 1) * D]        # (TB, D) anchor, reused per pair
            pieces = []
            for j in range(i + 1, F):
                xj = x_ref[:, j * D:(j + 1) * D]    # (TB, D) contiguous lane slice
                pieces += [xi, xj, xi * xj]         # [x_p1 | x_p2 | x_p1*x_p2]
            seg = jnp.concatenate(pieces, axis=-1)          # (TB, 3*L*D)
            o_ref[:, off * 3 * D:(off + L) * 3 * D] = seg   # one wide store / anchor
            off += L

    return kernel


def _pick_batch_tile(B: int, F: int, D: int, itemsize: int,
                     budget_bytes: int, max_tile: int = 2048) -> int:
    """Largest sublane-aligned TB whose padded, double-buffered tiles fit the budget."""
    P = F * (F - 1) // 2
    # Padded (lane rounded to 128) per-batch-row VMEM footprint, x2 double buffering.
    in_row = _roundup(F * D, 128) * itemsize
    out_row = _roundup(3 * P * D, 128) * itemsize
    per_row = 2 * (in_row + out_row)
    tb = max(1, budget_bytes // per_row)
    tb = min(tb, max_tile)               # body is statically unrolled over TB (code size)
    if B >= 64:
        tb = min(tb, pl.cdiv(B, 4))      # >=4 steps: 2 per TC on v7x + pipeline steady state
    elif B > 8:
        tb = min(tb, pl.cdiv(B, 2))      # >=2 steps: keep both v7x TensorCores busy
    tb = max(8, (tb // 8) * 8)           # sublane-aligned block shape
    if tb >= B:
        tb = B                           # single full block (block dim == array dim)
    return int(tb)


def pin_layer(x: jax.Array, num_field: int, batch_tile: int | None = None) -> jax.Array:
    """Pallas implementation of PINLayer.forward: (B, F, D) -> (B, P, 3*D)."""
    B, F, D = x.shape
    assert F == num_field
    P = num_field * (num_field - 1) // 2
    if P == 0 or B == 0:
        return jnp.zeros((B, P, 3 * D), dtype=x.dtype)

    itemsize = jnp.dtype(x.dtype).itemsize
    vmem_cap = _vmem_capacity_bytes()
    # ~40 MiB scratch budget on v7x (64 MiB VMEM), ~64 MiB on v5e/v6e (128 MiB).
    budget = max(8 * _MIB, min(5 * vmem_cap // 8, 64 * _MIB))
    vmem_limit = max(16 * _MIB, min(3 * vmem_cap // 4, 96 * _MIB))

    if batch_tile is None:
        tb = _pick_batch_tile(B, F, D, itemsize, budget)
    else:
        tb = int(min(batch_tile, B))     # caller-supplied: should be mult. of 8 or == B

    # Make sure the declared VMEM limit covers the actual padded footprint.
    in_row = _roundup(F * D, 128) * itemsize
    out_row = _roundup(3 * P * D, 128) * itemsize
    footprint = 2 * (in_row + out_row) * _roundup(tb, 8)
    vmem_limit = int(max(vmem_limit, footprint + 4 * _MIB))

    grid = (pl.cdiv(B, tb),)
    x2d = x.reshape(B, F * D)            # contiguous collapse -> free reshape

    out2d = pl.pallas_call(
        _make_kernel(F, D),
        out_shape=jax.ShapeDtypeStruct((B, P * 3 * D), x.dtype),
        grid_spec=pltpu.PrefetchScalarGridSpec(
            num_scalar_prefetch=0,
            grid=grid,
            in_specs=[pl.BlockSpec((tb, F * D), lambda b: (b, 0))],
            out_specs=pl.BlockSpec((tb, P * 3 * D), lambda b: (b, 0)),
        ),
        compiler_params=pltpu.CompilerParams(
            dimension_semantics=("parallel",),   # batch tiles shard across v7x TCs
            vmem_limit_bytes=vmem_limit,
        ),
    )(x2d)

    return out2d.reshape(B, P, 3 * D)    # contiguous split -> free reshape


def pin_layer_ref(x: jax.Array, num_field: int) -> jax.Array:
    """Pure-JAX reference (mirrors the PyTorch forward)."""
    p1, p2 = _pair_indices(num_field)
    x_p1 = x[:, p1, :]
    x_p2 = x[:, p2, :]
    return jnp.concatenate([x_p1, x_p2, x_p1 * x_p2], axis=-1)


if __name__ == "__main__":
    def _check(B, F, D, key, batch_tile=None):
        x = jax.random.normal(jax.random.PRNGKey(key), (B, F, D), dtype=jnp.float32)
        out = jax.block_until_ready(pin_layer(x, num_field=F, batch_tile=batch_tile))
        ref = pin_layer_ref(x, num_field=F)
        np.testing.assert_allclose(np.asarray(out), np.asarray(ref), rtol=1e-6, atol=1e-6)
        assert out.shape == (B, F * (F - 1) // 2, 3 * D)

    # Primary small deterministic example: batch=2, num_field=4, emb_dim=32.
    _check(2, 4, 32, key=0)
    # Multi-step batch grid with a partial tail block (sublane-aligned tile).
    _check(20, 5, 16, key=1, batch_tile=8)
    # Tiny-D case: both in/out lane widths < 128 (masked-edge path).
    _check(2, 3, 8, key=2)

    print("KERNEL_OK")
</pallas_src>

<mosaic_0001>
module attributes {stable_mosaic.version = 11 : i64} {
  func.func @kernel(%arg0: i32, %arg1: memref<2x128xf32, #tpu.memory_space<vmem>>, %arg2: memref<2x576xf32, #tpu.memory_space<vmem>>) attributes {dimension_semantics = [#tpu.dimension_semantics<parallel>], iteration_bounds = array<i64: 1>, scalar_prefetch = 0 : i64, scratch_operands = 0 : i64, tpu.core_type = #tpu.core_type<tc>, window_params = [{transform_indices = @transform_0, window_bounds = array<i64: 2, 128>}, {transform_indices = @transform_1, window_bounds = array<i64: 2, 576>}]} {
    %c0 = arith.constant 0 : index
    %c0_0 = arith.constant 0 : index
    %0 = vector.load %arg1[%c0, %c0_0] : memref<2x128xf32, #tpu.memory_space<vmem>>, vector<2x32xf32>
    %c0_1 = arith.constant 0 : index
    %c32 = arith.constant 32 : index
    %1 = vector.load %arg1[%c0_1, %c32] : memref<2x128xf32, #tpu.memory_space<vmem>>, vector<2x32xf32>
    %2 = arith.mulf %0, %1 : vector<2x32xf32>
    %c0_2 = arith.constant 0 : index
    %c64 = arith.constant 64 : index
    %3 = vector.load %arg1[%c0_2, %c64] : memref<2x128xf32, #tpu.memory_space<vmem>>, vector<2x32xf32>
    %4 = arith.mulf %0, %3 : vector<2x32xf32>
    %c0_3 = arith.constant 0 : index
    %c96 = arith.constant 96 : index
    %5 = vector.load %arg1[%c0_3, %c96] : memref<2x128xf32, #tpu.memory_space<vmem>>, vector<2x32xf32>
    %6 = arith.mulf %0, %5 : vector<2x32xf32>
    %7 = tpu.concatenate %0, %1, %2, %0, %3, %4, %0, %5, %6 in 1 : vector<2x32xf32>, vector<2x32xf32>, vector<2x32xf32>, vector<2x32xf32>, vector<2x32xf32>, vector<2x32xf32>, vector<2x32xf32>, vector<2x32xf32>, vector<2x32xf32> -> vector<2x288xf32>
    %c0_4 = arith.constant 0 : index
    %c0_5 = arith.constant 0 : index
    %8 = vector.load %arg2[%c0_4, %c0_5] : memref<2x576xf32, #tpu.memory_space<vmem>>, vector<2x288xf32>
    tpu.vector_store %arg2[%c0_4, %c0_5], %7 {strides = array<i32>} : memref<2x576xf32, #tpu.memory_space<vmem>>, vector<2x288xf32>,
    %c0_6 = arith.constant 0 : index
    %c32_7 = arith.constant 32 : index
    %9 = vector.load %arg1[%c0_6, %c32_7] : memref<2x128xf32, #tpu.memory_space<vmem>>, vector<2x32xf32>
    %c0_8 = arith.constant 0 : index
    %c64_9 = arith.constant 64 : index
    %10 = vector.load %arg1[%c0_8, %c64_9] : memref<2x128xf32, #tpu.memory_space<vmem>>, vector<2x32xf32>
    %11 = arith.mulf %9, %10 : vector<2x32xf32>
    %c0_10 = arith.constant 0 : index
    %c96_11 = arith.constant 96 : index
    %12 = vector.load %arg1[%c0_10, %c96_11] : memref<2x128xf32, #tpu.memory_space<vmem>>, vector<2x32xf32>
    %13 = arith.mulf %9, %12 : vector<2x32xf32>
    %14 = tpu.concatenate %9, %10, %11, %9, %12, %13 in 1 : vector<2x32xf32>, vector<2x32xf32>, vector<2x32xf32>, vector<2x32xf32>, vector<2x32xf32>, vector<2x32xf32> -> vector<2x192xf32>
    %c0_12 = arith.constant 0 : index
    %c288 = arith.constant 288 : index
    %15 = vector.load %arg2[%c0_12, %c288] : memref<2x576xf32, #tpu.memory_space<vmem>>, vector<2x192xf32>
    tpu.vector_store %arg2[%c0_12, %c288], %14 {strides = array<i32>} : memref<2x576xf32, #tpu.memory_space<vmem>>, vector<2x192xf32>,
    %c0_13 = arith.constant 0 : index
    %c64_14 = arith.constant 64 : index
    %16 = vector.load %arg1[%c0_13, %c64_14] : memref<2x128xf32, #tpu.memory_space<vmem>>, vector<2x32xf32>
    %c0_15 = arith.constant 0 : index
    %c96_16 = arith.constant 96 : index
    %17 = vector.load %arg1[%c0_15, %c96_16] : memref<2x128xf32, #tpu.memory_space<vmem>>, vector<2x32xf32>
    %18 = arith.mulf %16, %17 : vector<2x32xf32>
    %19 = tpu.concatenate %16, %17, %18 in 1 : vector<2x32xf32>, vector<2x32xf32>, vector<2x32xf32> -> vector<2x96xf32>
    %c0_17 = arith.constant 0 : index
    %c480 = arith.constant 480 : index
    %20 = vector.load %arg2[%c0_17, %c480] : memref<2x576xf32, #tpu.memory_space<vmem>>, vector<2x96xf32>
    tpu.vector_store %arg2[%c0_17, %c480], %19 {strides = array<i32>} : memref<2x576xf32, #tpu.memory_space<vmem>>, vector<2x96xf32>,
    return
  }
  func.func @transform_0(%arg0: i32) -> (i32, i32) {
    %c0_i32 = arith.constant 0 : i32
    %c0_i32_0 = arith.constant 0 : i32
    return %arg0, %c0_i32 : i32, i32
  }
  func.func @transform_1(%arg0: i32) -> (i32, i32) {
    %c0_i32 = arith.constant 0 : i32
    %c0_i32_0 = arith.constant 0 : i32
    return %arg0, %c0_i32 : i32, i32
  }
}

</mosaic_0001>

<bundles_post_ra>
// kernel: tpu_custom_call.1
= control target key start
LH: loop header
LB: loop body
LE: loop exit
PB: predicated region body
PF: predicated region fallthrough
CT: control target
= control target key end

     0   :  { %6 = vsyncpa [#allocation3], 0  ;;  %s250_s0 = inlined_call_operand.hbm [shape: f32[2,128], index: 0, kind: input, shape index: {}]   ;;  %s251_s1 = inlined_call_operand.hbm [shape: f32[2,576], index: 1, kind: output, shape index: {}]  }
   0x1   :  { %7 = vsyncpa [#allocation4], 0  ;;  %s208_s6 = smov [#allocation2]  }
   0x2   :  { %s14_s7 = sshll.u32 %s208_s6, 4  ;;  %s15_s7 = int_to_ptr.vmem [resolvable:$true] %s14_s7 }
   0x3   :  { %s172_s8 = scalar_lea.vmem %s15_s7, 32  ;;  %p177_p1 = scmp.lt.s32.totalorder %s15_s7, %s15_s7 }
   0x4   :  { %p173_p0 = scmp.ne.s32.totalorder %s15_s7, %s172_s8  ;;  %p178_p2 = scmp.lt.s32.totalorder %s172_s8, %s172_s8 }
   0x6   :  { %p179_p3 = por %p178_p2, %p177_p1 }
   0x8   :  { %p180_p4 = pnand %p179_p3, %p173_p0 }
   0xa   :  { %183 = shalt.err (!%p180_p4)
}
   0xb   :  { %17 = dma.hbm_to_vmem [thread:$0]  %s250_s0, 32, %s15_s7, [#allocation3]  }
   0xc   :  { %204 = dma.done.wait [#allocation3], 32  }
   0xd   :  { %205 = vsyncadd [#allocation3], 4294967264  ;;  %v77_v0 = vld [vmem:[#allocation2] sm:$0x3]  ;;  %s209_s11 = smov 96   ;;  %s210_s12 = smov 64   ;;  %v58_v13 = vlaneseq }
   0xe   :  { %v21_v1 = vld [vmem:[#allocation2] sm:$0x3]  ;;  %79 = vrot.lane.b32.xlu0 %v77_v0, %s209_s11  ;;  %s211_s13 = smov 32   ;;  %v212_v11 = vmov 1983009808   ;;  %vm43_vm0 = vcmask 261120  }
   0xf   :  { %23 = vrot.lane.b32.xlu1 %v21_v1, %s209_s11  ;;  %v116_v2 = vld [vmem:[#allocation2] sm:$0x3]  ;;  %v56_v12 = vunpack.c.l.s4 %v212_v11  ;;  %v59_v16 = vshrl.u32 %v58_v13, 7  ;;  %vm44_vm1 = vcmask 523264   ;;  %vm46_vm2 = vcmask 785408   ;;  %s213_s0 = smov [#allocation5]  }
  0x10   :  { %vm71_vm3 = vcmask 1041408   ;;  %vm72_vm4 = vcmask 1043458   ;;  %vm74_vm6 = vcmask 259076   ;;  %vm112_vm8 = vcmask 1041664   ;;  %s149_s14 = sshll.u32 %s213_s0, 4  ;;  %s150_s14 = int_to_ptr.vmem [resolvable:$true] %s149_s14 }
  0x11   :  { %v57_v15 = vunpack.c.0.s8 %v56_v12  ;;  %vm73_vm5 = vmor %vm72_vm4, %vm71_vm3  ;;  %vm113_vm9 = vcmask 781314   ;;  %vm139_vm11 = vcmask 1042176   ;;  %vm140_vm12 = vcmask 519170   ;;  %s184_s15 = scalar_lea.vmem %s150_s14, 160  ;;  %p189_p6 = scmp.lt.s32.totalorder %s150_s14, %s150_s14 }
  0x12   :  { %27 = vrot.lane.b32.xlu0 %v21_v1, %s210_s12  ;;  %vm75_vm7 = vmor %vm74_vm6, %vm73_vm5  ;;  %p185_p5 = scmp.ne.s32.totalorder %s150_s14, %s184_s15  ;;  %p190_p7 = scmp.lt.s32.totalorder %s184_s15, %s184_s15 }
  0x13   :  { %83 = vrot.lane.b32.xlu1 %v77_v0, %s210_s12  ;;  %v60_v21 = vsub.s32 %v57_v15, %v59_v16  ;;  %vm114_vm10 = vmor %vm113_vm9, %vm112_vm8 }
  0x14   :  { %vm141_vm13 = vmor %vm140_vm12, %vm139_vm11  ;;  %p191_p8 = por %p190_p7, %p189_p6 }
  0x16   :  { %p192_p9 = pnand %p191_p8, %p185_p5 }
  0x17   :  { %91 = vrot.lane.b32.xlu1 %v77_v0, %s211_s13 }
  0x1b   :  { %122 = vrot.lane.b32.xlu1 %v116_v2, %s210_s12 }
  0x80   :  { %v80_v3 = vpop.permute.xlu0 %79 }
  0x81   :  { %v24_v4 = vpop.permute.xlu1 %23  ;;  %v82_v5 = vmul.f32 %v80_v3, %v77_v0 }
  0x82   :  { %v26_v6 = vmul.f32 %v24_v4, %v21_v1 }
  0x83   :  { %88 = vrot.lane.b32.xlu0 %v82_v5, %s211_s13 }
  0x84   :  { %36 = vrot.lane.b32.xlu1 %v26_v6, %s210_s12  ;;  %v28_v7 = vpop.permute.xlu0 %27 }
  0x85   :  { %v30_v8 = vmul.f32 %v28_v7, %v21_v1  ;;  %v84_v9 = vpop.permute.xlu1 %83 }
  0x86   :  { %v86_v14 = vmul.f32 %v84_v9, %v77_v0 }
  0x87   :  { %118 = vrot.lane.b32.xlu0 %v116_v2, %s209_s11 }
  0x89   :  { %v92_v10 = vpop.permute.xlu1 %91 }
  0x8a   :  { %v96_v18 = vsel %vm43_vm0, %v92_v10, %v86_v14 }
  0x8b   :  { %40 = vrot.lane.b32.xlu0 %v30_v8, %s211_s13 }
  0x8d   :  { %v123_v17 = vpop.permute.xlu1 %122 }
  0x8f   :  { %31 = vrot.lane.b32.xlu0 %v21_v1, %s211_s13 }
  0xf5   :  { %v89_v19 = vpop.permute.xlu0 %88 }
  0xf6   :  { %v94_v20 = vsel %vm44_vm1, %v80_v3, %v89_v19  ;;  %v37_v25 = vpop.permute.xlu1 %36 }
  0xf7   :  { %v95_v22 = vsel %vm46_vm2, %v94_v20, %v84_v9  ;;  %v45_v29 = vsel %vm44_vm1, %v21_v1, %v37_v25 }
  0xf8   :  { %v99_v23 = vcombine.low %v95_v22, %v96_v18  ;;  %v47_v34 = vsel %vm46_vm2, %v45_v29, %v24_v4 }
  0xf9   :  { %v119_v24 = vpop.permute.xlu0 %118 }
  0xfa   :  { %v121_v26 = vmul.f32 %v119_v24, %v116_v2  ;;  %v106_v27 = vrot.slane %v99_v23, %v60_v21 }
  0xfc   :  { %107 = vrot.lane.b32.xlu1 %v106_v27, %s211_s13  ;;  %v125_v28 = vsel %vm44_vm1, %v123_v17, %v121_v26 }
  0xfd   :  { %v41_v30 = vpop.permute.xlu0 %40  ;;  %v133_v31 = vrot.slane %v125_v28, %v60_v21 }
  0xfe   :  { %v48_v32 = vsel %vm43_vm0, %v28_v7, %v41_v30 }
  0xff   :  { %v49_v33 = vsel %vm44_vm1, %v48_v32, %v28_v7  ;;  %134 = vrot.lane.b32.xlu0 %v133_v31, %s209_s11 }
 0x100   :  { %v50_v35 = vsel %vm46_vm2, %v49_v33, %v21_v1 }
 0x101   :  { %v54_v36 = vcombine.low %v47_v34, %v50_v35  ;;  %v32_v37 = vpop.permute.xlu0 %31 }
 0x102   :  { %v34_v38 = vmul.f32 %v32_v37, %v21_v1 }
 0x103   :  { %v61_v39 = vrot.slane %v54_v36, %v60_v21 }
 0x104   :  { %v68_v40 = vrot.slane %v34_v38, %v60_v21 }
 0x106   :  { %v69_v41 = vcombine.low %v61_v39, %v68_v40 }
 0x108   :  { %76 = vst.msk [vmem:[#allocation5] sm:$0x3f] %vm75_vm7, %v69_v41 }
 0x16e   :  { %v108_v42 = vpop.permute.xlu1 %107 }
 0x16f   :  { %v109_v43 = vrot.slane %v108_v42, 6 }
 0x171   :  { %v110_v44 = vsel %vm43_vm0, %v109_v43, %v108_v42  ;;  %v135_v45 = vpop.permute.xlu0 %134 }
 0x172   :  { %v136_v46 = vrot.slane %v135_v45, 6  ;;  %115 = vst.msk [vmem:[#allocation5 + $0x4] sm:$0xf] %vm114_vm10, %v110_v44 }
 0x174   :  { %v137_v47 = vsel %vm46_vm2, %v136_v46, %v135_v45 }
 0x175   :  { %142 = vst.msk [vmem:[#allocation5 + $0x6] sm:$0xf] %vm141_vm13, %v137_v47 }
 0x176   :  { %195 = shalt.err (!%p192_p9)
}
 0x177   :  { %152 = dma.vmem_to_hbm [thread:$0]  %s150_s14, 160, %s251_s1, [#allocation4]  }
 0x178   :  { %206 = dma.done.wait [#allocation4], 160  }
 0x179   :  { %207 = vsyncadd [#allocation4], 4294967136 }
 0x17a   :  { %156 = vsyncpa [#allocation3], 1 }
 0x17b   :  { %157 = vsyncpa [#allocation4], 1 }

</bundles_post_ra>
